<compile_context>
chip_gen: v7x
topology: tpu7x:2x2x1
jax: 0.10.0
libtpu: 0.0.40
codegen_flags: <defaults>
</compile_context>

<pallas_src>
import functools

import jax
import jax.numpy as jnp
from jax.experimental import pallas as pl
from jax.experimental.pallas import tpu as pltpu

_LANES = 128
_TM_MAX = 4096          # rows/tile -> 4096*128*4B = 2 MiB per buffer
_MIN_TM_LARGE = 1024    # never shrink tiles below this when splitting for megacore


def _round_up(n, m):
    return ((n + m - 1) // m) * m


# ---------------------------------------------------------------------------
# Specialized path: in_features == out_features == 1  ->  y = x * w + b (VPU)
# ---------------------------------------------------------------------------
def _affine_kernel(wb_ref, x_ref, o_ref):
    # wb_ref: SMEM (2,) f32 = [w, b]   (resident scalars, read once per tile)
    # x_ref/o_ref: (TM, 128) f32 lane-dense tiles
    o_ref[...] = x_ref[...] * wb_ref[0] + wb_ref[1]


def _choose_tm(rows):
    """Pick a row-tile size: big enough to amortize per-step pipeline overhead,
    small enough to keep 4 double-buffered tiles well under every generation's
    scoped-VMEM default, and (for large inputs) leaving >= ~4 grid steps so the
    'parallel' axis feeds both v7x TensorCores."""
    if rows <= _TM_MAX:
        return rows                               # single step, whole slab resident
    tm = _round_up(-(-rows // 4), 8)              # aim for ~4 grid steps
    return max(_MIN_TM_LARGE, min(_TM_MAX, tm))


@functools.partial(jax.jit, static_argnames=())
def _affine_forward(x, wb):
    """y = x * w + b for nn.Linear(1, 1).  x: (N, 1) f32 -> (N, 1) f32."""
    N = x.shape[0]

    # Repack (N, 1) -> lane-dense (rows, 128) f32 slab; rows multiple of 8.
    rows = max(-(-N // _LANES), 1)
    rows = _round_up(rows, 8)
    TM = _choose_tm(rows)
    rows_padded = _round_up(rows, TM)
    total = rows_padded * _LANES

    x_flat = x.reshape(-1).astype(jnp.float32)
    if total != N:
        # NOTE: padded tail rows compute w*0 + b = b; they are sliced off below.
        x_flat = jnp.pad(x_flat, (0, total - N))
    x2d = x_flat.reshape(rows_padded, _LANES)

    grid = (rows_padded // TM,)

    out2d = pl.pallas_call(
        _affine_kernel,
        out_shape=jax.ShapeDtypeStruct((rows_padded, _LANES), jnp.float32),
        grid=grid,
        in_specs=[
            pl.BlockSpec(memory_space=pltpu.MemorySpace.SMEM),     # [w, b] scalars
            pl.BlockSpec((TM, _LANES), lambda i: (i, 0)),          # x tile
        ],
        out_specs=pl.BlockSpec((TM, _LANES), lambda i: (i, 0)),    # y tile (lane-dense)
        compiler_params=pltpu.CompilerParams(
            dimension_semantics=("parallel",)),
        cost_estimate=pl.CostEstimate(
            flops=2 * total,
            transcendentals=0,
            bytes_accessed=2 * 4 * total),                          # read x + write y
    )(wb, x2d)

    y_flat = out2d.reshape(-1)
    if total != N:
        y_flat = y_flat[:N]
    return y_flat.reshape(N, 1)


# ---------------------------------------------------------------------------
# General path: row-tiled matmul, weights/bias resident, lane-padded out_dim
# ---------------------------------------------------------------------------
def _matmul_kernel(x_ref, w_ref, b_ref, o_ref):
    o_ref[...] = (
        jnp.dot(x_ref[...], w_ref[...],
                preferred_element_type=jnp.float32,
                precision=jax.lax.Precision.HIGHEST)
        + b_ref[...]
    ).astype(o_ref.dtype)


@functools.partial(jax.jit, static_argnames=())
def _matmul_forward(x, w, b):
    """y = x @ w.T + b.  x: (N, in), w: (out, in), b: (out,)."""
    N, in_dim = x.shape
    out_dim = w.shape[0]

    # Pad out_dim to a lane multiple so output stores are unmasked lane-dense.
    out_p = _round_up(out_dim, _LANES)

    TM = min(_round_up(max(N, 8), 8), 1024)
    rows_padded = _round_up(max(N, 8), TM)

    xp = jnp.pad(x.astype(jnp.float32), ((0, rows_padded - N), (0, 0)))
    wt = jnp.pad(w.T.astype(jnp.float32), ((0, 0), (0, out_p - out_dim)))  # (in, out_p)
    bp = jnp.pad(b.astype(jnp.float32), (0, out_p - out_dim)).reshape(1, out_p)

    grid = (rows_padded // TM,)

    # TODO(synk): add K/N grid tiling + VMEM accumulator (P3) for layers whose
    # resident weight exceeds a few MiB; unnecessary for this module's shapes.
    out = pl.pallas_call(
        _matmul_kernel,
        out_shape=jax.ShapeDtypeStruct((rows_padded, out_p), jnp.float32),
        grid=grid,
        in_specs=[
            pl.BlockSpec((TM, in_dim), lambda i: (i, 0)),
            pl.BlockSpec((in_dim, out_p), lambda i: (0, 0)),
            pl.BlockSpec((1, out_p), lambda i: (0, 0)),
        ],
        out_specs=pl.BlockSpec((TM, out_p), lambda i: (i, 0)),
        compiler_params=pltpu.CompilerParams(
            dimension_semantics=("parallel",)),
        cost_estimate=pl.CostEstimate(
            flops=2 * rows_padded * in_dim * out_p,
            transcendentals=0,
            bytes_accessed=4 * (rows_padded * in_dim + in_dim * out_p
                                + out_p + rows_padded * out_p)),
    )(xp, wt, bp)

    return out[:N, :out_dim]


def linear_forward(x, w, b, wb=None):
    """torch.nn.Linear-equivalent forward: y = x @ w.T + b."""
    if w.shape[0] == 1 and w.shape[1] == 1:
        if wb is None:
            wb = jnp.concatenate([w.reshape(-1), b.reshape(-1)]).astype(jnp.float32)
        return _affine_forward(x, wb)
    return _matmul_forward(x, w, b)


class LinearRegression:
    """Pallas-backed equivalent of the PyTorch LinearRegression module."""

    def __init__(self, input_size, output_size, key):
        # Deterministic init mimicking nn.Linear's uniform(-1/sqrt(in), 1/sqrt(in)).
        k_w, k_b = jax.random.split(key)
        bound = 1.0 / (input_size ** 0.5)
        self.weight = jax.random.uniform(
            k_w, (output_size, input_size), jnp.float32, -bound, bound
        )
        self.bias = jax.random.uniform(
            k_b, (output_size,), jnp.float32, -bound, bound
        )
        # Hoisted once (perf review): scalars packed for the SMEM-resident input.
        self._wb = jnp.concatenate(
            [self.weight.reshape(-1), self.bias.reshape(-1)]
        ).astype(jnp.float32)

    def __call__(self, x):
        return linear_forward(x, self.weight, self.bias, wb=self._wb)


if __name__ == "__main__":
    input_dim = 1
    output_dim = 1

    key = jax.random.PRNGKey(0)
    k_params, k_x = jax.random.split(key)

    model = LinearRegression(input_dim, output_dim, k_params)

    # Small batch of scalar inputs, shape (N, input_dim) like torch.nn.Linear expects.
    x = jax.random.normal(k_x, (8, input_dim), jnp.float32)

    y = model(x)
    y = jax.block_until_ready(y)

    # Cross-check against plain JAX reference.
    y_ref = x @ model.weight.T + model.bias
    assert y.shape == (8, output_dim)
    assert jnp.allclose(y, y_ref, atol=1e-5), "mismatch vs reference"

    # Also check the literal [2, 4] input from the original script.
    x2 = jnp.array([[2.0], [4.0]], jnp.float32)
    y2 = jax.block_until_ready(model(x2))
    y2_ref = x2 @ model.weight.T + model.bias
    assert jnp.allclose(y2, y2_ref, atol=1e-5), "mismatch vs reference (demo input)"

    # Exercise the general (lane-padded MXU) path once as well.
    k_w2, k_x2 = jax.random.split(k_x)
    w2 = jax.random.normal(k_w2, (4, 8), jnp.float32) * 0.1
    b2 = jnp.arange(4, dtype=jnp.float32) * 0.01
    x3 = jax.random.normal(k_x2, (16, 8), jnp.float32)
    y3 = jax.block_until_ready(linear_forward(x3, w2, b2))
    y3_ref = x3 @ w2.T + b2
    assert jnp.allclose(y3, y3_ref, atol=1e-4), "mismatch vs reference (matmul path)"

    print("KERNEL_OK")
</pallas_src>

<mosaic_0001>
module attributes {stable_mosaic.version = 11 : i64} {
  func.func @_affine_kernel(%arg0: i32, %arg1: memref<2xf32, #tpu.memory_space<smem>>, %arg2: memref<8x128xf32, #tpu.memory_space<vmem>>, %arg3: memref<8x128xf32, #tpu.memory_space<vmem>>) attributes {dimension_semantics = [#tpu.dimension_semantics<parallel>], iteration_bounds = array<i64: 1>, scalar_prefetch = 0 : i64, scratch_operands = 0 : i64, tpu.core_type = #tpu.core_type<tc>, window_params = [{transform_indices = @transform_0, window_bounds = array<i64: 2>}, {transform_indices = @transform_1, window_bounds = array<i64: 8, 128>}, {transform_indices = @transform_2, window_bounds = array<i64: 8, 128>}]} {
    %c0 = arith.constant 0 : index
    %c0_0 = arith.constant 0 : index
    %0 = vector.load %arg2[%c0, %c0_0] : memref<8x128xf32, #tpu.memory_space<vmem>>, vector<8x128xf32>
    %c0_1 = arith.constant 0 : index
    %1 = memref.load %arg1[%c0_1] : memref<2xf32, #tpu.memory_space<smem>>
    %2 = vector.broadcast %1 : f32 to vector<8x128xf32>
    %3 = arith.mulf %0, %2 : vector<8x128xf32>
    %c1 = arith.constant 1 : index
    %4 = memref.load %arg1[%c1] : memref<2xf32, #tpu.memory_space<smem>>
    %5 = vector.broadcast %4 : f32 to vector<8x128xf32>
    %6 = arith.addf %3, %5 : vector<8x128xf32>
    %c0_2 = arith.constant 0 : index
    %c0_3 = arith.constant 0 : index
    %7 = vector.load %arg3[%c0_2, %c0_3] : memref<8x128xf32, #tpu.memory_space<vmem>>, vector<8x128xf32>
    tpu.vector_store %arg3[%c0_2, %c0_3], %6 {strides = array<i32>} : memref<8x128xf32, #tpu.memory_space<vmem>>, vector<8x128xf32>,
    return
  }
  func.func @transform_0(%arg0: i32) -> i32 {
    %c0_i32 = arith.constant 0 : i32
    %c0_i32_0 = arith.constant 0 : i32
    return %c0_i32 : i32
  }
  func.func @transform_1(%arg0: i32) -> (i32, i32) {
    %c0_i32 = arith.constant 0 : i32
    %c0_i32_0 = arith.constant 0 : i32
    return %arg0, %c0_i32 : i32, i32
  }
  func.func @transform_2(%arg0: i32) -> (i32, i32) {
    %c0_i32 = arith.constant 0 : i32
    %c0_i32_0 = arith.constant 0 : i32
    return %arg0, %c0_i32 : i32, i32
  }
}

</mosaic_0001>

<bundles_post_ra>
// kernel: _affine_forward.1
= control target key start
LH: loop header
LB: loop body
LE: loop exit
PB: predicated region body
PF: predicated region fallthrough
CT: control target
= control target key end

     0   :  { %7 = vsyncpa [#allocation3], 0  ;;  %s78_s0 = inlined_call_operand.vmem [shape: f32[2], index: 0, kind: input, shape index: {}]   ;;  %s79_s1 = inlined_call_operand.vmem [shape: f32[8,128], index: 1, kind: input, shape index: {}]   ;;  %s80_s2 = inlined_call_operand.vmem [shape: f32[8,128], index: 2, kind: output, shape index: {}]  }
   0x1   :  { %s14_s11 = sshll.u32 %s78_s0, 4  ;;  %s15_s11 = int_to_ptr.vmem [resolvable:$true] %s14_s11 }
   0x2   :  { %s39_s12 = scalar_lea.vmem %s15_s11, 16  ;;  %p44_p1 = scmp.lt.s32.totalorder %s15_s11, %s15_s11 }
   0x3   :  { %p40_p0 = scmp.ne.s32.totalorder %s15_s11, %s39_s12  ;;  %p45_p2 = scmp.lt.s32.totalorder %s39_s12, %s39_s12 }
   0x5   :  { %p46_p3 = por %p45_p2, %p44_p1 }
   0x7   :  { %p47_p4 = pnand %p46_p3, %p40_p0 }
   0x9   :  { %50 = shalt.err (!%p47_p4)
}
   0xa   :  { %s53_s13 = smov [#allocation2]  }
   0xb   :  { %17 = dma.vmem_to_smem %s15_s11, 16, %s53_s13, [#allocation3]  }
   0xc   :  { %51 = dma.done.wait [#allocation3], 16  }
   0xd   :  { %52 = vsyncadd [#allocation3], 4294967280 }
   0xe   :  { %23 = sfence }
   0xf   :  { %s25_s14 = sld [smem:[#allocation2]]  ;;  %s37_s15 = sld [smem:[#allocation2 + $0x1]]  ;;  %v24_v0 = vld [vmem:[%s79_s1] sm:$0xff] }
  0x15   :  { %v26_v1 = vstv %s25_s14  ;;  %v29_v2 = vstv %s37_s15 }
  0x16   :  { %v27_v3 = vmul.f32 %v26_v1, %v24_v0 }
  0x18   :  { %v30_v4 = vadd.f32 %v29_v2, %v27_v3 }
  0x1a   :  { %31 = vst [vmem:[%s80_s2] sm:$0xff] %v30_v4 }
  0x1b   :  { %36 = vsyncpa [#allocation3], 1 }

</bundles_post_ra>
